<compile_context>
chip_gen: v7x
topology: tpu7x:2x2x1
jax: 0.10.0
libtpu: 0.0.40
codegen_flags: <defaults>
</compile_context>

<pallas_src>
import functools

import jax
import jax.numpy as jnp
import numpy as np
from jax.experimental import pallas as pl
from jax.experimental.pallas import tpu as pltpu


def _tree_sum(terms):
    """Pairwise (tree) reduction of a list of arrays: exposes ILP for the VALU slots."""
    terms = list(terms)
    while len(terms) > 1:
        nxt = [terms[i] + terms[i + 1] for i in range(0, len(terms) - 1, 2)]
        if len(terms) % 2:
            nxt.append(terms[-1])
        terms = nxt
    return terms[0]


def _avgpool_lane_kernel(x_ref, o_ref, *, kh, kw, ho, wo):
    # x_ref: (H, W, L_blk)  -- fused N*C on the 128-lane axis.
    # o_ref: (Ho, Wo, L_blk)
    x = x_ref[...].astype(jnp.float32)  # single hoisted cast (no-op when already f32)
    # Row pass: slices along the *outer* H axis (address offsets only, no relayout).
    rowsum = _tree_sum([x[dy:dy + ho, :, :] for dy in range(kh)])
    # Column pass on the reduced (Ho, W, L) slab: sublane shifts (XLU) overlap VALU adds.
    total = _tree_sum([rowsum[:, dx:dx + wo, :] for dx in range(kw)])
    o_ref[...] = (total * (1.0 / float(kh * kw))).astype(o_ref.dtype)


def _pick_lane_block(l_pad, h, w, ho, wo, itemsize):
    """Largest lane block (multiple of 128) that divides l_pad, fits the VMEM budget,
    and (when possible) leaves >= 2 grid blocks so both v7x TensorCores get work."""
    m = l_pad // 128
    # Per-128-lane VMEM bytes: double-buffered in/out tiles + f32 working set in-kernel.
    per128 = 128 * (2 * (h * w + ho * wo) * itemsize + (h * w + ho * w + ho * wo) * 4)
    budget = 20 * 1024 * 1024  # stay well under the 32 MiB scoped default (v7x-safe)
    cap = max(1, min(8, budget // max(per128, 1)))  # block <= 1024 lanes
    divisors = [d for d in range(1, m + 1) if m % d == 0 and d <= cap]
    if m >= 2:
        two_plus = [d for d in divisors if m // d >= 2]
        if two_plus:
            return 128 * max(two_plus)
    return 128 * max(divisors)


def simple_spatial_module(x, spatial_size=7, spatial_type="avg"):
    """JAX/Pallas equivalent of SimpleSpatialModule.forward.

    x: (N, C, H, W) array. Returns (N, C, H-kh+1, W-kw+1)."""
    assert spatial_type == "avg"
    if isinstance(spatial_size, int):
        kh = kw = spatial_size
    else:
        kh, kw = spatial_size

    n, c, h, w = x.shape
    ho, wo = h - kh + 1, w - kw + 1
    assert ho > 0 and wo > 0, "spatial_size larger than input spatial dims"

    l_total = n * c
    # Channels-last, lane-dense layout: (H, W, N*C).
    x_l = jnp.transpose(x, (2, 3, 0, 1)).reshape(h, w, l_total)

    if l_total <= 128:
        # Full-dim lane block satisfies the (8,128)-or-full-dim rule.
        l_pad, l_blk = l_total, l_total
    else:
        l_pad = ((l_total + 127) // 128) * 128
        l_blk = _pick_lane_block(l_pad, h, w, ho, wo, x.dtype.itemsize)
        if l_pad != l_total:
            x_l = jnp.pad(x_l, ((0, 0), (0, 0), (0, l_pad - l_total)))

    grid = (l_pad // l_blk,)
    kernel = functools.partial(_avgpool_lane_kernel, kh=kh, kw=kw, ho=ho, wo=wo)

    # Advisory scheduler hint: separable pooling does (kh + kw) adds per output element.
    flops = int((kh + kw) * ho * wo * l_pad)
    bytes_accessed = int((h * w + ho * wo) * l_pad * x.dtype.itemsize)

    # TODO(synk): add halo-tiled H blocking for inputs whose (H*W*128-lane) slab exceeds VMEM.
    out_l = pl.pallas_call(
        kernel,
        out_shape=jax.ShapeDtypeStruct((ho, wo, l_pad), x.dtype),
        grid_spec=pltpu.PrefetchScalarGridSpec(
            num_scalar_prefetch=0,
            grid=grid,
            in_specs=[pl.BlockSpec((h, w, l_blk), lambda j: (0, 0, j))],
            out_specs=pl.BlockSpec((ho, wo, l_blk), lambda j: (0, 0, j)),
        ),
        compiler_params=pltpu.CompilerParams(
            dimension_semantics=("parallel",),
            vmem_limit_bytes=32 * 1024 * 1024,
        ),
        cost_estimate=pl.CostEstimate(
            flops=flops, transcendentals=0, bytes_accessed=bytes_accessed
        ),
    )(x_l)

    out_l = out_l[:, :, :l_total]
    # Back to NCHW.
    return out_l.reshape(ho, wo, n, c).transpose(2, 3, 0, 1)


def _reference_avgpool(x, k):
    # Pure-JAX reference via reduce_window (NCHW, stride 1, valid padding).
    summed = jax.lax.reduce_window(
        x.astype(jnp.float32),
        0.0,
        jax.lax.add,
        window_dimensions=(1, 1, k, k),
        window_strides=(1, 1, 1, 1),
        padding="VALID",
    )
    return (summed / float(k * k)).astype(x.dtype)


if __name__ == "__main__":
    key = jax.random.PRNGKey(0)
    # batch=2, channels=4, spatial=16, spatial_size=7 -> output (2, 4, 10, 10)
    x = jax.random.normal(key, (2, 4, 16, 16), dtype=jnp.float32)

    out = simple_spatial_module(x, spatial_size=7)
    out = jax.block_until_ready(out)

    ref = _reference_avgpool(x, 7)
    np.testing.assert_allclose(np.asarray(out), np.asarray(ref), rtol=1e-5, atol=1e-5)

    print("KERNEL_OK")
</pallas_src>

<mosaic_0001>
module attributes {stable_mosaic.version = 11 : i64} {
  func.func @_avgpool_lane_kernel(%arg0: i32, %arg1: memref<16x16x8xf32, #tpu.memory_space<vmem>>, %arg2: memref<10x10x8xf32, #tpu.memory_space<vmem>>) attributes {dimension_semantics = [#tpu.dimension_semantics<parallel>], iteration_bounds = array<i64: 1>, scalar_prefetch = 0 : i64, scratch_operands = 0 : i64, tpu.core_type = #tpu.core_type<tc>, window_params = [{transform_indices = @transform_0, window_bounds = array<i64: 16, 16, 8>}, {transform_indices = @transform_1, window_bounds = array<i64: 10, 10, 8>}]} {
    %c0 = arith.constant 0 : index
    %c0_0 = arith.constant 0 : index
    %c0_1 = arith.constant 0 : index
    %0 = vector.load %arg1[%c0, %c0_0, %c0_1] : memref<16x16x8xf32, #tpu.memory_space<vmem>>, vector<16x16x8xf32>
    %1 = vector.extract_strided_slice %0 {offsets = [0, 0, 0], sizes = [10, 16, 8], strides = [1, 1, 1]} : vector<16x16x8xf32> to vector<10x16x8xf32>
    %2 = vector.extract_strided_slice %0 {offsets = [1, 0, 0], sizes = [10, 16, 8], strides = [1, 1, 1]} : vector<16x16x8xf32> to vector<10x16x8xf32>
    %3 = vector.extract_strided_slice %0 {offsets = [2, 0, 0], sizes = [10, 16, 8], strides = [1, 1, 1]} : vector<16x16x8xf32> to vector<10x16x8xf32>
    %4 = vector.extract_strided_slice %0 {offsets = [3, 0, 0], sizes = [10, 16, 8], strides = [1, 1, 1]} : vector<16x16x8xf32> to vector<10x16x8xf32>
    %5 = vector.extract_strided_slice %0 {offsets = [4, 0, 0], sizes = [10, 16, 8], strides = [1, 1, 1]} : vector<16x16x8xf32> to vector<10x16x8xf32>
    %6 = vector.extract_strided_slice %0 {offsets = [5, 0, 0], sizes = [10, 16, 8], strides = [1, 1, 1]} : vector<16x16x8xf32> to vector<10x16x8xf32>
    %7 = vector.extract_strided_slice %0 {offsets = [6, 0, 0], sizes = [10, 16, 8], strides = [1, 1, 1]} : vector<16x16x8xf32> to vector<10x16x8xf32>
    %8 = arith.addf %1, %2 : vector<10x16x8xf32>
    %9 = arith.addf %3, %4 : vector<10x16x8xf32>
    %10 = arith.addf %5, %6 : vector<10x16x8xf32>
    %11 = arith.addf %8, %9 : vector<10x16x8xf32>
    %12 = arith.addf %10, %7 : vector<10x16x8xf32>
    %13 = arith.addf %11, %12 : vector<10x16x8xf32>
    %14 = vector.extract_strided_slice %13 {offsets = [0, 0, 0], sizes = [10, 10, 8], strides = [1, 1, 1]} : vector<10x16x8xf32> to vector<10x10x8xf32>
    %15 = vector.extract_strided_slice %13 {offsets = [0, 1, 0], sizes = [10, 10, 8], strides = [1, 1, 1]} : vector<10x16x8xf32> to vector<10x10x8xf32>
    %16 = vector.extract_strided_slice %13 {offsets = [0, 2, 0], sizes = [10, 10, 8], strides = [1, 1, 1]} : vector<10x16x8xf32> to vector<10x10x8xf32>
    %17 = vector.extract_strided_slice %13 {offsets = [0, 3, 0], sizes = [10, 10, 8], strides = [1, 1, 1]} : vector<10x16x8xf32> to vector<10x10x8xf32>
    %18 = vector.extract_strided_slice %13 {offsets = [0, 4, 0], sizes = [10, 10, 8], strides = [1, 1, 1]} : vector<10x16x8xf32> to vector<10x10x8xf32>
    %19 = vector.extract_strided_slice %13 {offsets = [0, 5, 0], sizes = [10, 10, 8], strides = [1, 1, 1]} : vector<10x16x8xf32> to vector<10x10x8xf32>
    %20 = vector.extract_strided_slice %13 {offsets = [0, 6, 0], sizes = [10, 10, 8], strides = [1, 1, 1]} : vector<10x16x8xf32> to vector<10x10x8xf32>
    %21 = arith.addf %14, %15 : vector<10x10x8xf32>
    %22 = arith.addf %16, %17 : vector<10x10x8xf32>
    %23 = arith.addf %18, %19 : vector<10x10x8xf32>
    %24 = arith.addf %21, %22 : vector<10x10x8xf32>
    %25 = arith.addf %23, %20 : vector<10x10x8xf32>
    %26 = arith.addf %24, %25 : vector<10x10x8xf32>
    %cst = arith.constant 0.0204081628 : f32
    %27 = vector.broadcast %cst : f32 to vector<10x10x8xf32>
    %28 = arith.mulf %26, %27 : vector<10x10x8xf32>
    %c0_2 = arith.constant 0 : index
    %c0_3 = arith.constant 0 : index
    %c0_4 = arith.constant 0 : index
    %29 = vector.load %arg2[%c0_2, %c0_3, %c0_4] : memref<10x10x8xf32, #tpu.memory_space<vmem>>, vector<10x10x8xf32>
    tpu.vector_store %arg2[%c0_2, %c0_3, %c0_4], %28 {strides = array<i32>} : memref<10x10x8xf32, #tpu.memory_space<vmem>>, vector<10x10x8xf32>,
    return
  }
  func.func @transform_0(%arg0: i32) -> (i32, i32, i32) {
    %c0_i32 = arith.constant 0 : i32
    %c0_i32_0 = arith.constant 0 : i32
    %c0_i32_1 = arith.constant 0 : i32
    return %c0_i32, %c0_i32_0, %arg0 : i32, i32, i32
  }
  func.func @transform_1(%arg0: i32) -> (i32, i32, i32) {
    %c0_i32 = arith.constant 0 : i32
    %c0_i32_0 = arith.constant 0 : i32
    %c0_i32_1 = arith.constant 0 : i32
    return %c0_i32, %c0_i32_0, %arg0 : i32, i32, i32
  }
}

</mosaic_0001>

<bundles_post_ra>
// kernel: tpu_custom_call.1
= control target key start
LH: loop header
LB: loop body
LE: loop exit
PB: predicated region body
PF: predicated region fallthrough
CT: control target
= control target key end

     0   :  { %vm148_vm0 = vcmask 1046528   ;;  %vm239_vm1 = vcmask 1045504   ;;  %vm400_vm2 = vcmask 1043456   ;;  %vm493_vm3 = vcmask 58368   ;;  %s847_s0 = inlined_call_operand.vmem [shape: f32[16,16,8], index: 0, kind: input, shape index: {}]   ;;  %s848_s1 = inlined_call_operand.vmem [shape: f32[10,10,8], index: 1, kind: output, shape index: {}]  }
   0x1   :  { %v8_v0 = vld [vmem:[%s847_s0] sm:$0xff]  ;;  %v9_v1 = vld [vmem:[%s847_s0 + $0x8] sm:$0xff]  ;;  %v10_v2 = vld [vmem:[%s847_s0 + $0x10] sm:$0xff]  ;;  %vm491_vm4 = vcmask 64512  }
   0x2   :  { %v11_v3 = vld [vmem:[%s847_s0 + $0x18] sm:$0xff]  ;;  %v12_v4 = vld [vmem:[%s847_s0 + $0x20] sm:$0xff]  ;;  %v13_v5 = vld [vmem:[%s847_s0 + $0x28] sm:$0xff]  ;;  %v40_v6 = vadd.f32 %v10_v2, %v8_v0 }
   0x3   :  { %v14_v7 = vld [vmem:[%s847_s0 + $0x30] sm:$0xff]  ;;  %v15_v8 = vld [vmem:[%s847_s0 + $0x38] sm:$0xff]  ;;  %v16_v9 = vld [vmem:[%s847_s0 + $0x40] sm:$0xff]  ;;  %v41_v10 = vadd.f32 %v11_v3, %v9_v1  ;;  %v42_v11 = vadd.f32 %v12_v4, %v10_v2  ;;  %v43_v12 = vadd.f32 %v13_v5, %v11_v3 }
   0x4   :  { %v17_v13 = vld [vmem:[%s847_s0 + $0x48] sm:$0xff]  ;;  %v18_v14 = vld [vmem:[%s847_s0 + $0x50] sm:$0xff]  ;;  %v19_v15 = vld [vmem:[%s847_s0 + $0x58] sm:$0xff]  ;;  %v44_v16 = vadd.f32 %v14_v7, %v12_v4  ;;  %v45_v17 = vadd.f32 %v15_v8, %v13_v5  ;;  %v563_v18 = vadd.f32 %v16_v9, %v14_v7 }
   0x5   :  { %v20_v19 = vld [vmem:[%s847_s0 + $0x60] sm:$0xff]  ;;  %v21_v20 = vld [vmem:[%s847_s0 + $0x68] sm:$0xff]  ;;  %v571_v21 = vadd.f32 %v18_v14, %v16_v9  ;;  %v573_v22 = vadd.f32 %v19_v15, %v17_v13  ;;  %v578_v23 = vld [vmem:[%s847_s0 + $0x70] sm:$0xff]  ;;  %v580_v24 = vadd.f32 %v17_v13, %v15_v8 }
   0x6   :  { %v68_v25 = vadd.f32 %v44_v16, %v40_v6  ;;  %v69_v26 = vadd.f32 %v45_v17, %v41_v10  ;;  %v585_v27 = vld [vmem:[%s847_s0 + $0x78] sm:$0xff]  ;;  %v587_v28 = vadd.f32 %v20_v19, %v18_v14  ;;  %v589_v29 = vadd.f32 %v21_v20, %v19_v15  ;;  %v608_v40 = vld [vmem:[%s847_s0 + $0x80] sm:$0xff]  ;;  %v613_v41 = vld [vmem:[%s847_s0 + $0x88] sm:$0xff] }
   0x7   :  { %v88_v30 = vadd.f32 %v571_v21, %v20_v19  ;;  %v89_v31 = vadd.f32 %v573_v22, %v21_v20  ;;  %v70_v32 = vadd.f32 %v563_v18, %v42_v11  ;;  %v71_v33 = vadd.f32 %v580_v24, %v43_v12 }
   0x8   :  { %v90_v34 = vadd.f32 %v587_v28, %v578_v23  ;;  %v91_v35 = vadd.f32 %v589_v29, %v585_v27  ;;  %v600_v36 = vadd.f32 %v578_v23, %v20_v19  ;;  %v603_v37 = vadd.f32 %v585_v27, %v21_v20 }
   0x9   :  { %v108_v38 = vadd.f32 %v88_v30, %v68_v25  ;;  %v109_v39 = vadd.f32 %v89_v31, %v69_v26  ;;  %v72_v42 = vadd.f32 %v571_v21, %v44_v16  ;;  %v73_v43 = vadd.f32 %v573_v22, %v45_v17 }
   0xa   :  { %v110_v44 = vadd.f32 %v90_v34, %v70_v32  ;;  %v111_v45 = vadd.f32 %v91_v35, %v71_v33  ;;  %v92_v46 = vadd.f32 %v600_v36, %v608_v40  ;;  %v93_v47 = vadd.f32 %v603_v37, %v613_v41 }
   0xb   :  { %v149_v48 = vrot.slane %v108_v38, 1  ;;  %v150_v49 = vrot.slane %v109_v39, 1  ;;  %v310_v50 = vrot.slane %v108_v38, 2  ;;  %v311_v51 = vrot.slane %v109_v39, 2 }
   0xc   :  { %v152_v52 = vrot.slane %v110_v44, 1  ;;  %v153_v53 = vrot.slane %v111_v45, 1  ;;  %v313_v54 = vrot.slane %v110_v44, 2  ;;  %v314_v55 = vrot.slane %v111_v45, 2 }
   0xd   :  { %v151_v56 = vsel %vm148_vm0, %v149_v48, %v150_v49  ;;  %v200_v57 = vadd.f32 %v150_v49, %v109_v39  ;;  %v312_v58 = vsel %vm239_vm1, %v310_v50, %v311_v51  ;;  %v112_v59 = vadd.f32 %v92_v46, %v72_v42 }
   0xe   :  { %v199_v60 = vadd.f32 %v151_v56, %v108_v38  ;;  %v154_v61 = vsel %vm148_vm0, %v152_v52, %v153_v53  ;;  %v202_v62 = vadd.f32 %v153_v53, %v111_v45  ;;  %v315_v63 = vsel %vm239_vm1, %v313_v54, %v314_v55  ;;  %v27_v52 = vld [vmem:[%s847_s0 + $0x98] sm:$0xff] }
   0xf   :  { %v241_v0 = vrot.slane %v200_v57, 2  ;;  %v361_v1 = vadd.f32 %v311_v51, %v200_v57  ;;  %v201_v2 = vadd.f32 %v154_v61, %v110_v44  ;;  %v113_v3 = vadd.f32 %v93_v47, %v73_v43  ;;  %v26_v51 = vld [vmem:[%s847_s0 + $0x90] sm:$0xff] }
  0x10   :  { %v240_v4 = vrot.slane %v199_v60, 2  ;;  %v360_v5 = vadd.f32 %v312_v58, %v199_v60  ;;  %v244_v6 = vrot.slane %v202_v62, 2  ;;  %v363_v7 = vadd.f32 %v314_v55, %v202_v62 }
  0x11   :  { %v402_v8 = vrot.slane %v361_v1, 4  ;;  %v291_v9 = vadd.f32 %v241_v0, %v200_v57  ;;  %v243_v10 = vrot.slane %v201_v2, 2  ;;  %v362_v11 = vadd.f32 %v315_v63, %v201_v2 }
  0x12   :  { %v242_v12 = vsel %vm239_vm1, %v240_v4, %v241_v0  ;;  %v401_v13 = vrot.slane %v360_v5, 4  ;;  %v405_v14 = vrot.slane %v363_v7, 4  ;;  %v293_v15 = vadd.f32 %v244_v6, %v202_v62  ;;  %v28_v4 = vld [vmem:[%s847_s0 + $0xa0] sm:$0xff] }
  0x13   :  { %v290_v16 = vadd.f32 %v242_v12, %v199_v60  ;;  %v452_v17 = vadd.f32 %v402_v8, %v291_v9  ;;  %v245_v19 = vsel %vm239_vm1, %v243_v10, %v244_v6  ;;  %v404_v20 = vrot.slane %v362_v11, 4  ;;  %v29_v12 = vld [vmem:[%s847_s0 + $0xa8] sm:$0xff] }
  0x14   :  { %v403_v25 = vsel %vm400_vm2, %v401_v13, %v402_v8  ;;  %v292_v26 = vadd.f32 %v245_v19, %v201_v2  ;;  %v454_v30 = vadd.f32 %v405_v14, %v293_v15  ;;  %v155_v31 = vrot.slane %v112_v59, 1 }
  0x15   :  { %v451_v32 = vadd.f32 %v403_v25, %v290_v16  ;;  %v472_v33 = vmul.f32 0.020408163, %v452_v17  ;;  %v406_v34 = vsel %vm400_vm2, %v404_v20, %v405_v14  ;;  %v156_v35 = vrot.slane %v113_v3, 1 }
  0x16   :  { %v453_v38 = vadd.f32 %v406_v34, %v292_v26  ;;  %v474_v39 = vmul.f32 0.020408163, %v454_v30  ;;  %v316_v42 = vrot.slane %v112_v59, 2  ;;  %v317_v43 = vrot.slane %v113_v3, 2 }
  0x17   :  { %v471_v44 = vmul.f32 0.020408163, %v451_v32  ;;  %494 = vst.msk [vmem:[%s848_s1 + $0x8] sm:$0x3] %vm493_vm3, %v472_v33  ;;  %v157_v45 = vsel %vm148_vm0, %v155_v31, %v156_v35  ;;  %v204_v46 = vadd.f32 %v156_v35, %v113_v3  ;;  %v636_v47 = vadd.f32 %v608_v40, %v578_v23 }
  0x18   :  { %v473_v48 = vmul.f32 0.020408163, %v453_v38  ;;  %496 = vst.msk [vmem:[%s848_s1 + $0x18] sm:$0x3] %vm493_vm3, %v474_v39  ;;  %v203_v49 = vadd.f32 %v157_v45, %v112_v59  ;;  %v318_v50 = vsel %vm239_vm1, %v316_v42, %v317_v43  ;;  %v651_v23 = vadd.f32 %v613_v41, %v585_v27 }
  0x19   :  { %492 = vst.msk [vmem:[%s848_s1] sm:$0xff] %vm491_vm4, %v471_v44  ;;  %v247_v53 = vrot.slane %v204_v46, 2  ;;  %v365_v54 = vadd.f32 %v317_v43, %v204_v46  ;;  %v74_v55 = vadd.f32 %v587_v28, %v563_v18  ;;  %v75_v56 = vadd.f32 %v589_v29, %v580_v24 }
  0x1a   :  { %495 = vst.msk [vmem:[%s848_s1 + $0x10] sm:$0xff] %vm491_vm4, %v473_v48  ;;  %v246_v27 = vrot.slane %v203_v49, 2  ;;  %v364_v57 = vadd.f32 %v318_v50, %v203_v49  ;;  %v94_v58 = vadd.f32 %v636_v47, %v26_v51  ;;  %v95_v59 = vadd.f32 %v651_v23, %v27_v52 }
  0x1b   :  { %v408_v60 = vrot.slane %v365_v54, 4  ;;  %v295_v61 = vadd.f32 %v247_v53, %v204_v46  ;;  %v668_v62 = vadd.f32 %v26_v51, %v608_v40  ;;  %v671_v18 = vadd.f32 %v27_v52, %v613_v41 }
  0x1c   :  { %v248_v24 = vsel %vm239_vm1, %v246_v27, %v247_v53  ;;  %v407_v63 = vrot.slane %v364_v57, 4  ;;  %v114_v0 = vadd.f32 %v94_v58, %v74_v55  ;;  %v115_v1 = vadd.f32 %v95_v59, %v75_v56  ;;  %v30_v53 = vld [vmem:[%s847_s0 + $0xb0] sm:$0xff]  ;;  %v31_v59 = vld [vmem:[%s847_s0 + $0xb8] sm:$0xff] }
  0x1d   :  { %v294_v2 = vadd.f32 %v248_v24, %v203_v49  ;;  %v456_v3 = vadd.f32 %v408_v60, %v295_v61  ;;  %v76_v5 = vadd.f32 %v600_v36, %v571_v21  ;;  %v77_v40 = vadd.f32 %v603_v37, %v573_v22 }
  0x1e   :  { %v409_v41 = vsel %vm400_vm2, %v407_v63, %v408_v60  ;;  %v158_v6 = vrot.slane %v114_v0, 1  ;;  %v159_v7 = vrot.slane %v115_v1, 1  ;;  %v319_v8 = vrot.slane %v114_v0, 2 }
  0x1f   :  { %v455_v9 = vadd.f32 %v409_v41, %v294_v2  ;;  %v476_v10 = vmul.f32 0.020408163, %v456_v3  ;;  %v320_v11 = vrot.slane %v115_v1, 2  ;;  %v96_v13 = vadd.f32 %v668_v62, %v28_v4 }
  0x20   :  { %v160_v14 = vsel %vm148_vm0, %v158_v6, %v159_v7  ;;  %v206_v21 = vadd.f32 %v159_v7, %v115_v1  ;;  %v97_v15 = vadd.f32 %v671_v18, %v29_v12  ;;  %v688_v22 = vadd.f32 %v28_v4, %v26_v51 }
  0x21   :  { %v475_v16 = vmul.f32 0.020408163, %v455_v9  ;;  %498 = vst.msk [vmem:[%s848_s1 + $0x28] sm:$0x3] %vm493_vm3, %v476_v10  ;;  %v205_v17 = vadd.f32 %v160_v14, %v114_v0  ;;  %v321_v19 = vsel %vm239_vm1, %v319_v8, %v320_v11  ;;  %v116_v20 = vadd.f32 %v96_v13, %v76_v5  ;;  %v32_v14 = vld [vmem:[%s847_s0 + $0xc0] sm:$0xff] }
  0x22   :  { %v250_v25 = vrot.slane %v206_v21, 2  ;;  %v367_v26 = vadd.f32 %v320_v11, %v206_v21  ;;  %v117_v30 = vadd.f32 %v97_v15, %v77_v40  ;;  %v695_v31 = vadd.f32 %v29_v12, %v27_v52 }
  0x23   :  { %497 = vst.msk [vmem:[%s848_s1 + $0x20] sm:$0xff] %vm491_vm4, %v475_v16  ;;  %v249_v32 = vrot.slane %v205_v17, 2  ;;  %v366_v33 = vadd.f32 %v321_v19, %v205_v17  ;;  %v161_v34 = vrot.slane %v116_v20, 1  ;;  %v322_v35 = vrot.slane %v116_v20, 2 }
  0x24   :  { %v411_v38 = vrot.slane %v367_v26, 4  ;;  %v297_v39 = vadd.f32 %v250_v25, %v206_v21  ;;  %v162_v42 = vrot.slane %v117_v30, 1  ;;  %v323_v43 = vrot.slane %v117_v30, 2 }
  0x25   :  { %v251_v44 = vsel %vm239_vm1, %v249_v32, %v250_v25  ;;  %v410_v45 = vrot.slane %v366_v33, 4  ;;  %v78_v46 = vadd.f32 %v636_v47, %v587_v28  ;;  %v79_v48 = vadd.f32 %v651_v23, %v589_v29 }
  0x26   :  { %v296_v49 = vadd.f32 %v251_v44, %v205_v17  ;;  %v458_v50 = vadd.f32 %v411_v38, %v297_v39  ;;  %v163_v51 = vsel %vm148_vm0, %v161_v34, %v162_v42  ;;  %v208_v52 = vadd.f32 %v162_v42, %v117_v30  ;;  %v33_v17 = vld [vmem:[%s847_s0 + $0xc8] sm:$0xff] }
  0x27   :  { %v412_v54 = vsel %vm400_vm2, %v410_v45, %v411_v38  ;;  %v207_v55 = vadd.f32 %v163_v51, %v116_v20  ;;  %v324_v56 = vsel %vm239_vm1, %v322_v35, %v323_v43  ;;  %v98_v27 = vadd.f32 %v688_v22, %v30_v53 }
  0x28   :  { %v457_v28 = vadd.f32 %v412_v54, %v296_v49  ;;  %v478_v57 = vmul.f32 0.020408163, %v458_v50  ;;  %v253_v58 = vrot.slane %v208_v52, 2  ;;  %v369_v29 = vadd.f32 %v323_v43, %v208_v52 }
  0x29   :  { %v252_v60 = vrot.slane %v207_v55, 2  ;;  %v368_v61 = vadd.f32 %v324_v56, %v207_v55  ;;  %v99_v24 = vadd.f32 %v695_v31, %v31_v59  ;;  %v118_v63 = vadd.f32 %v98_v27, %v78_v46 }
  0x2a   :  { %v477_v0 = vmul.f32 0.020408163, %v457_v28  ;;  %500 = vst.msk [vmem:[%s848_s1 + $0x38] sm:$0x3] %vm493_vm3, %v478_v57  ;;  %v414_v1 = vrot.slane %v369_v29, 4  ;;  %v299_v2 = vadd.f32 %v253_v58, %v208_v52  ;;  %v721_v3 = vadd.f32 %v30_v53, %v28_v4  ;;  %v34_v57 = vld [vmem:[%s847_s0 + $0xd0] sm:$0xff] }
  0x2b   :  { %v254_v5 = vsel %vm239_vm1, %v252_v60, %v253_v58  ;;  %v413_v40 = vrot.slane %v368_v61, 4  ;;  %v119_v41 = vadd.f32 %v99_v24, %v79_v48  ;;  %v164_v6 = vrot.slane %v118_v63, 1 }
  0x2c   :  { %499 = vst.msk [vmem:[%s848_s1 + $0x30] sm:$0xff] %vm491_vm4, %v477_v0  ;;  %v298_v7 = vadd.f32 %v254_v5, %v207_v55  ;;  %v460_v8 = vadd.f32 %v414_v1, %v299_v2  ;;  %v325_v9 = vrot.slane %v118_v63, 2  ;;  %v728_v10 = vadd.f32 %v31_v59, %v29_v12 }
  0x2d   :  { %v415_v11 = vsel %vm400_vm2, %v413_v40, %v414_v1  ;;  %v165_v13 = vrot.slane %v119_v41, 1  ;;  %v326_v4 = vrot.slane %v119_v41, 2  ;;  %v80_v21 = vadd.f32 %v668_v62, %v600_v36 }
  0x2e   :  { %v459_v15 = vadd.f32 %v415_v11, %v298_v7  ;;  %v480_v16 = vmul.f32 0.020408163, %v460_v8  ;;  %v81_v12 = vadd.f32 %v671_v18, %v603_v37  ;;  %v100_v19 = vadd.f32 %v721_v3, %v32_v14 }
  0x2f   :  { %v166_v20 = vsel %vm148_vm0, %v164_v6, %v165_v13  ;;  %v210_v25 = vadd.f32 %v165_v13, %v119_v41  ;;  %v327_v26 = vsel %vm239_vm1, %v325_v9, %v326_v4  ;;  %v101_v30 = vadd.f32 %v728_v10, %v33_v17 }
  0x30   :  { %v479_v32 = vmul.f32 0.020408163, %v459_v15  ;;  %502 = vst.msk [vmem:[%s848_s1 + $0x48] sm:$0x3] %vm493_vm3, %v480_v16  ;;  %v209_v36 = vadd.f32 %v166_v20, %v118_v63  ;;  %v120_v33 = vadd.f32 %v100_v19, %v80_v21  ;;  %v749_v34 = vadd.f32 %v32_v14, %v30_v53  ;;  %v35_v63 = vld [vmem:[%s847_s0 + $0xd8] sm:$0xff] }
  0x31   :  { %v256_v37 = vrot.slane %v210_v25, 2  ;;  %v371_v35 = vadd.f32 %v326_v4, %v210_v25  ;;  %v121_v38 = vadd.f32 %v101_v30, %v81_v12  ;;  %v751_v39 = vadd.f32 %v33_v17, %v31_v59 }
  0x32   :  { %501 = vst.msk [vmem:[%s848_s1 + $0x40] sm:$0xff] %vm491_vm4, %v479_v32  ;;  %v255_v42 = vrot.slane %v209_v36, 2  ;;  %v370_v43 = vadd.f32 %v327_v26, %v209_v36  ;;  %v167_v44 = vrot.slane %v120_v33, 1  ;;  %v328_v45 = vrot.slane %v120_v33, 2  ;;  %v37_v32 = vld [vmem:[%s847_s0 + $0xe8] sm:$0xff] }
  0x33   :  { %v417_v46 = vrot.slane %v371_v35, 4  ;;  %v301_v48 = vadd.f32 %v256_v37, %v210_v25  ;;  %v168_v49 = vrot.slane %v121_v38, 1  ;;  %v329_v50 = vrot.slane %v121_v38, 2 }
  0x34   :  { %v257_v51 = vsel %vm239_vm1, %v255_v42, %v256_v37  ;;  %v416_v52 = vrot.slane %v370_v43, 4  ;;  %v82_v53 = vadd.f32 %v688_v22, %v636_v47  ;;  %v83_v54 = vadd.f32 %v695_v31, %v651_v23 }
  0x35   :  { %v300_v55 = vadd.f32 %v257_v51, %v209_v36  ;;  %v462_v56 = vadd.f32 %v417_v46, %v301_v48  ;;  %v169_v27 = vsel %vm148_vm0, %v167_v44, %v168_v49  ;;  %v212_v28 = vadd.f32 %v168_v49, %v121_v38 }
  0x36   :  { %v418_v58 = vsel %vm400_vm2, %v416_v52, %v417_v46  ;;  %v211_v29 = vadd.f32 %v169_v27, %v120_v33  ;;  %v330_v59 = vsel %vm239_vm1, %v328_v45, %v329_v50  ;;  %v102_v60 = vadd.f32 %v749_v34, %v34_v57 }
  0x37   :  { %v461_v47 = vadd.f32 %v418_v58, %v300_v55  ;;  %v482_v61 = vmul.f32 0.020408163, %v462_v56  ;;  %v259_v24 = vrot.slane %v212_v28, 2  ;;  %v373_v23 = vadd.f32 %v329_v50, %v212_v28  ;;  %v38_v55 = vld [vmem:[%s847_s0 + $0xf0] sm:$0xff] }
  0x38   :  { %v258_v0 = vrot.slane %v211_v29, 2  ;;  %v372_v1 = vadd.f32 %v330_v59, %v211_v29  ;;  %v103_v2 = vadd.f32 %v751_v39, %v35_v63  ;;  %v122_v5 = vadd.f32 %v102_v60, %v82_v53 }
  0x39   :  { %v481_v40 = vmul.f32 0.020408163, %v461_v47  ;;  %504 = vst.msk [vmem:[%s848_s1 + $0x58] sm:$0x3] %vm493_vm3, %v482_v61  ;;  %v420_v41 = vrot.slane %v373_v23, 4  ;;  %v303_v6 = vadd.f32 %v259_v24, %v212_v28  ;;  %v64_v7 = vadd.f32 %v34_v57, %v32_v14  ;;  %v36_v14 = vld [vmem:[%s847_s0 + $0xe0] sm:$0xff] }
  0x3a   :  { %v260_v8 = vsel %vm239_vm1, %v258_v0, %v259_v24  ;;  %v419_v9 = vrot.slane %v372_v1, 4  ;;  %v123_v11 = vadd.f32 %v103_v2, %v83_v54  ;;  %v170_v13 = vrot.slane %v122_v5, 1  ;;  %v39_v47 = vld [vmem:[%s847_s0 + $0xf8] sm:$0xff] }
  0x3b   :  { %503 = vst.msk [vmem:[%s848_s1 + $0x50] sm:$0xff] %vm491_vm4, %v481_v40  ;;  %v302_v4 = vadd.f32 %v260_v8, %v211_v29  ;;  %v464_v21 = vadd.f32 %v420_v41, %v303_v6  ;;  %v331_v15 = vrot.slane %v122_v5, 2  ;;  %v65_v16 = vadd.f32 %v35_v63, %v33_v17 }
  0x3c   :  { %v421_v12 = vsel %vm400_vm2, %v419_v9, %v420_v41  ;;  %v171_v19 = vrot.slane %v123_v11, 1  ;;  %v332_v20 = vrot.slane %v123_v11, 2  ;;  %v84_v25 = vadd.f32 %v721_v3, %v668_v62 }
  0x3d   :  { %v463_v26 = vadd.f32 %v421_v12, %v302_v4  ;;  %v484_v30 = vmul.f32 0.020408163, %v464_v21  ;;  %v85_v17 = vadd.f32 %v728_v10, %v671_v18  ;;  %v104_v36 = vadd.f32 %v64_v7, %v36_v14 }
  0x3e   :  { %v172_v33 = vsel %vm148_vm0, %v170_v13, %v171_v19  ;;  %v214_v37 = vadd.f32 %v171_v19, %v123_v11  ;;  %v333_v35 = vsel %vm239_vm1, %v331_v15, %v332_v20  ;;  %v105_v38 = vadd.f32 %v65_v16, %v37_v32 }
  0x3f   :  { %v483_v42 = vmul.f32 0.020408163, %v463_v26  ;;  %506 = vst.msk [vmem:[%s848_s1 + $0x68] sm:$0x3] %vm493_vm3, %v484_v30  ;;  %v213_v62 = vadd.f32 %v172_v33, %v122_v5  ;;  %v124_v3 = vadd.f32 %v104_v36, %v84_v25  ;;  %v66_v43 = vadd.f32 %v36_v14, %v34_v57 }
  0x40   :  { %v262_v44 = vrot.slane %v214_v37, 2  ;;  %v375_v45 = vadd.f32 %v332_v20, %v214_v37  ;;  %v125_v46 = vadd.f32 %v105_v38, %v85_v17  ;;  %v67_v18 = vadd.f32 %v37_v32, %v35_v63 }
  0x41   :  { %505 = vst.msk [vmem:[%s848_s1 + $0x60] sm:$0xff] %vm491_vm4, %v483_v42  ;;  %v261_v10 = vrot.slane %v213_v62, 2  ;;  %v374_v48 = vadd.f32 %v333_v35, %v213_v62  ;;  %v173_v49 = vrot.slane %v124_v3, 1  ;;  %v334_v50 = vrot.slane %v124_v3, 2 }
  0x42   :  { %v423_v51 = vrot.slane %v375_v45, 4  ;;  %v305_v52 = vadd.f32 %v262_v44, %v214_v37  ;;  %v174_v53 = vrot.slane %v125_v46, 1  ;;  %v335_v54 = vrot.slane %v125_v46, 2 }
  0x43   :  { %v263_v56 = vsel %vm239_vm1, %v261_v10, %v262_v44  ;;  %v422_v27 = vrot.slane %v374_v48, 4  ;;  %v86_v28 = vadd.f32 %v749_v34, %v688_v22  ;;  %v87_v57 = vadd.f32 %v751_v39, %v695_v31 }
  0x44   :  { %v304_v58 = vadd.f32 %v263_v56, %v213_v62  ;;  %v466_v29 = vadd.f32 %v423_v51, %v305_v52  ;;  %v175_v59 = vsel %vm148_vm0, %v173_v49, %v174_v53  ;;  %v216_v60 = vadd.f32 %v174_v53, %v125_v46 }
  0x45   :  { %v424_v61 = vsel %vm400_vm2, %v422_v27, %v423_v51  ;;  %v215_v24 = vadd.f32 %v175_v59, %v124_v3  ;;  %v336_v23 = vsel %vm239_vm1, %v334_v50, %v335_v54  ;;  %v106_v63 = vadd.f32 %v66_v43, %v38_v55 }
  0x46   :  { %v465_v0 = vadd.f32 %v424_v61, %v304_v58  ;;  %v486_v22 = vmul.f32 0.020408163, %v466_v29  ;;  %v265_v34 = vrot.slane %v216_v60, 2  ;;  %v377_v1 = vadd.f32 %v335_v54, %v216_v60 }
  0x47   :  { %v264_v31 = vrot.slane %v215_v24, 2  ;;  %v376_v39 = vadd.f32 %v336_v23, %v215_v24  ;;  %v107_v2 = vadd.f32 %v67_v18, %v39_v47  ;;  %v126_v5 = vadd.f32 %v106_v63, %v86_v28 }
  0x48   :  { %v485_v40 = vmul.f32 0.020408163, %v465_v0  ;;  %508 = vst.msk [vmem:[%s848_s1 + $0x78] sm:$0x3] %vm493_vm3, %v486_v22  ;;  %v426_v41 = vrot.slane %v377_v1, 4  ;;  %v307_v6 = vadd.f32 %v265_v34, %v216_v60 }
  0x49   :  { %v266_v7 = vsel %vm239_vm1, %v264_v31, %v265_v34  ;;  %v425_v8 = vrot.slane %v376_v39, 4  ;;  %v127_v9 = vadd.f32 %v107_v2, %v87_v57  ;;  %v176_v11 = vrot.slane %v126_v5, 1 }
  0x4a   :  { %507 = vst.msk [vmem:[%s848_s1 + $0x70] sm:$0xff] %vm491_vm4, %v485_v40  ;;  %v306_v13 = vadd.f32 %v266_v7, %v215_v24  ;;  %v468_v4 = vadd.f32 %v426_v41, %v307_v6  ;;  %v337_v21 = vrot.slane %v126_v5, 2 }
  0x4b   :  { %v427_v15 = vsel %vm400_vm2, %v425_v8, %v426_v41  ;;  %v177_v16 = vrot.slane %v127_v9, 1  ;;  %v338_v12 = vrot.slane %v127_v9, 2 }
  0x4c   :  { %v467_v19 = vadd.f32 %v427_v15, %v306_v13  ;;  %v488_v20 = vmul.f32 0.020408163, %v468_v4 }
  0x4d   :  { %v178_v14 = vsel %vm148_vm0, %v176_v11, %v177_v16  ;;  %v218_v25 = vadd.f32 %v177_v16, %v127_v9  ;;  %v339_v26 = vsel %vm239_vm1, %v337_v21, %v338_v12 }
  0x4e   :  { %v487_v30 = vmul.f32 0.020408163, %v467_v19  ;;  %510 = vst.msk [vmem:[%s848_s1 + $0x88] sm:$0x3] %vm493_vm3, %v488_v20  ;;  %v217_v32 = vadd.f32 %v178_v14, %v126_v5 }
  0x4f   :  { %v268_v17 = vrot.slane %v218_v25, 2  ;;  %v379_v36 = vadd.f32 %v338_v12, %v218_v25 }
  0x50   :  { %509 = vst.msk [vmem:[%s848_s1 + $0x80] sm:$0xff] %vm491_vm4, %v487_v30  ;;  %v267_v33 = vrot.slane %v217_v32, 2  ;;  %v378_v37 = vadd.f32 %v339_v26, %v217_v32 }
  0x51   :  { %v429_v35 = vrot.slane %v379_v36, 4  ;;  %v309_v38 = vadd.f32 %v268_v17, %v218_v25 }
  0x52   :  { %v269_v42 = vsel %vm239_vm1, %v267_v33, %v268_v17  ;;  %v428_v62 = vrot.slane %v378_v37, 4 }
  0x53   :  { %v308_v3 = vadd.f32 %v269_v42, %v217_v32  ;;  %v470_v43 = vadd.f32 %v429_v35, %v309_v38 }
  0x54   :  { %v430_v44 = vsel %vm400_vm2, %v428_v62, %v429_v35 }
  0x55   :  { %v469_v45 = vadd.f32 %v430_v44, %v308_v3  ;;  %v490_v46 = vmul.f32 0.020408163, %v470_v43 }
  0x57   :  { %v489_v18 = vmul.f32 0.020408163, %v469_v45  ;;  %512 = vst.msk [vmem:[%s848_s1 + $0x98] sm:$0x3] %vm493_vm3, %v490_v46 }
  0x59   :  { %511 = vst.msk [vmem:[%s848_s1 + $0x90] sm:$0xff] %vm491_vm4, %v489_v18 }

</bundles_post_ra>
